<compile_context>
chip_gen: v7x
topology: tpu7x:2x2x1
jax: 0.10.0
libtpu: 0.0.40
codegen_flags: <defaults>
</compile_context>

<pallas_src>
import functools

import jax
import jax.numpy as jnp
from jax.experimental import pallas as pl
from jax.experimental.pallas import tpu as pltpu

# SpanLabel enum from the original repo
SPAN_INVALID = 0
SPAN_ASPECT = 1
SPAN_OPINION = 2

_INVALID_FILL = 1e20     # torch: masked rows get 1e20 in the INVALID column
_PAD_NEG = -1e30         # pad-label columns: large negative bias (finite in f32)
_LP = 128                # label dim padded to one full lane (lane-dense stores)


def _round_up(x, m):
    return ((x + m - 1) // m) * m


def ner_kernel(x_ref, ml_ref, w1_ref, b1_ref, w2_ref, b2_ref, wc_ref, bc_ref,
               probs_ref, loss_ref):
    """One row tile: FFNN -> classifier -> masked softmax + CE partial sum."""
    # FeedForward: Linear -> ReLU -> (dropout: identity), x2.  bf16 MXU
    # operands with f32 accumulation; elementwise math stays f32 (v5e-safe).
    x = x_ref[...].astype(jnp.bfloat16)                               # (TM, D)
    h1 = jnp.dot(x, w1_ref[...], preferred_element_type=jnp.float32) + b1_ref[...]
    h1 = jnp.maximum(h1, 0.0)
    h2 = jnp.dot(h1.astype(jnp.bfloat16), w2_ref[...],
                 preferred_element_type=jnp.float32) + b2_ref[...]
    h2 = jnp.maximum(h2, 0.0)

    # Classifier (label dim padded to 128; pad columns carry a -1e30 bias).
    scores = jnp.dot(h2.astype(jnp.bfloat16), wc_ref[...],
                     preferred_element_type=jnp.float32) + bc_ref[...]  # (TM, LP)

    ml = ml_ref[...]                                                  # (TM, 1) i32
    keep = ml >= 0                                                    # valid & unmasked
    col = jax.lax.broadcasted_iota(jnp.int32, scores.shape, 1)        # (TM, LP)

    # ner_scores[..., INVALID] = where(mask, ner_scores[..., INVALID], 1e20)
    scores = jnp.where((col == SPAN_INVALID) & (~keep),
                       jnp.float32(_INVALID_FILL), scores)

    # Softmax over labels (pad columns -> exp == 0, denominator unchanged).
    m = jnp.max(scores, axis=-1, keepdims=True)
    e = jnp.exp(scores - m)
    s = jnp.sum(e, axis=-1, keepdims=True)
    probs_ref[...] = (e / s).astype(probs_ref.dtype)

    # CrossEntropy(reduction='sum') over kept rows, reduced here to a single
    # lane-dense (1, LP) partial per tile.  where() with a boolean (not a mask
    # multiply) keeps NaN/Inf from ragged/garbage rows out of the sum.
    lse = m + jnp.log(s)                                              # (TM, 1)
    contrib = jnp.where(keep & (col == ml), lse - scores, 0.0)        # (TM, LP)
    loss_ref[...] = jnp.sum(contrib, axis=0, keepdims=True).reshape(loss_ref.shape)


def prepare_params(params):
    """One-time weight prep: pad to MXU-friendly tiles, cast matmul operands
    to bf16.  Done once at init so every forward call skips a full HBM pass."""
    w1, b1, w2, b2, wc, bc = params
    D, H = w1.shape
    L = wc.shape[1]
    # v6e/v7x MXU is 256-wide: round H > 128 up to a 256 multiple; a small H
    # stays at 128 (padding it to 256 would be pure wasted zero-FLOPs).
    Hp = 128 if H <= 128 else _round_up(H, 256)
    w1p = jnp.zeros((D, Hp), jnp.bfloat16).at[:, :H].set(w1.astype(jnp.bfloat16))
    b1p = jnp.zeros((1, Hp), jnp.float32).at[0, :H].set(b1.astype(jnp.float32))
    w2p = jnp.zeros((Hp, Hp), jnp.bfloat16).at[:H, :H].set(w2.astype(jnp.bfloat16))
    b2p = jnp.zeros((1, Hp), jnp.float32).at[0, :H].set(b2.astype(jnp.float32))
    wcp = jnp.zeros((Hp, _LP), jnp.bfloat16).at[:H, :L].set(wc.astype(jnp.bfloat16))
    bcp = jnp.full((1, _LP), _PAD_NEG, jnp.float32).at[0, :L].set(bc.astype(jnp.float32))
    return (w1p, b1p, w2p, b2p, wcp, bcp)


def _vmem_capacity_bytes():
    try:
        return int(pltpu.get_tpu_info().vmem_capacity_bytes)
    except Exception:
        return 64 * 1024 * 1024   # conservative fallback: v7x per-core VMEM


def _choose_tile_rows(n_rows, requested):
    tm = max(8, min(_round_up(requested, 8), _round_up(n_rows, 8)))
    # v7x megacore: if everything fits one tile but there is real work, split
    # into two tiles so ("parallel",) can shard rows across both TensorCores.
    if tm >= n_rows and n_rows >= 512:
        tm = max(256, _round_up((n_rows + 1) // 2, 8))
    return tm


@functools.partial(jax.jit, static_argnames=("n_labels", "tile_rows"))
def ner_forward(span_embeddings, span_mask, span_labels, prepared_params,
                *, n_labels=3, tile_rows=1024):
    B, S, D = span_embeddings.shape
    N = B * S
    w1p, b1p, w2p, b2p, wcp, bcp = prepared_params
    Hp = w1p.shape[1]
    LP = wcp.shape[1]

    TM = _choose_tile_rows(N, tile_rows)
    num_tiles = -(-N // TM)
    N_pad = num_tiles * TM

    # Activations stream straight from the caller's layout: no pad/cast pass.
    x = span_embeddings.reshape(N, D)

    # Packed mask+labels: label id for valid rows, -1 for masked rows and for
    # ragged-tile padding rows (keeps garbage rows out of the loss).  Tiny.
    labels_flat = span_labels.reshape(N).astype(jnp.int32)
    mask_flat = span_mask.reshape(N).astype(jnp.int32)
    ml = jnp.full((N_pad, 1), -1, jnp.int32).at[:N, 0].set(
        jnp.where(mask_flat > 0, labels_flat, -1))

    # --- VMEM budget: resident weights (single-buffer worth) + double-buffered
    # per-tile streams + intermediates, with 2x margin, capped at 75% of the
    # chip's physical VMEM (leaves compiler headroom on v7x's 64 MiB). ---
    xb = jnp.dtype(span_embeddings.dtype).itemsize
    weights = (D * Hp + Hp * Hp + Hp * LP) * 2 + (2 * Hp + LP) * 4
    per_tile_io = TM * D * xb + TM * 4 + TM * LP * 2 + LP * 4
    temps = TM * Hp * (4 + 2) * 2 + TM * LP * 4 * 4
    vmem_est = weights + 2 * per_tile_io + temps
    vmem_cap = _vmem_capacity_bytes()
    vmem_limit = int(min(max(2 * vmem_est, 32 * 1024 * 1024), (vmem_cap * 3) // 4))

    probs, loss_partials = pl.pallas_call(
        ner_kernel,
        out_shape=(jax.ShapeDtypeStruct((N, LP), jnp.bfloat16),
                   jax.ShapeDtypeStruct((num_tiles, 1, LP), jnp.float32)),
        grid=(num_tiles,),
        in_specs=[
            pl.BlockSpec((TM, D), lambda i: (i, 0)),    # x tile (ragged last tile ok)
            pl.BlockSpec((TM, 1), lambda i: (i, 0)),    # packed mask/labels tile
            pl.BlockSpec((D, Hp), lambda i: (0, 0)),    # w1 (resident)
            pl.BlockSpec((1, Hp), lambda i: (0, 0)),    # b1 (resident)
            pl.BlockSpec((Hp, Hp), lambda i: (0, 0)),   # w2 (resident)
            pl.BlockSpec((1, Hp), lambda i: (0, 0)),    # b2 (resident)
            pl.BlockSpec((Hp, LP), lambda i: (0, 0)),   # wc (resident)
            pl.BlockSpec((1, LP), lambda i: (0, 0)),    # bc (resident)
        ],
        out_specs=(pl.BlockSpec((TM, LP), lambda i: (i, 0)),
                   pl.BlockSpec((1, 1, LP), lambda i: (i, 0, 0))),
        compiler_params=pltpu.CompilerParams(
            dimension_semantics=("parallel",),
            vmem_limit_bytes=vmem_limit),
    )(x, ml, w1p, b1p, w2p, b2p, wcp, bcp)

    probs = probs[:, :n_labels].astype(jnp.float32).reshape(B, S, n_labels)
    loss = jnp.sum(loss_partials)   # masked / ragged rows contribute exactly 0

    return {
        "ner_scores": probs,
        "opinion_scores": probs[..., SPAN_OPINION],
        "target_scores": probs[..., SPAN_ASPECT],
        "loss": loss,
    }


def init_params(key, span_embed_dim, hidden_dim, n_labels):
    k1, k2, k3 = jax.random.split(key, 3)
    # FeedForward linear layers (synthetic deterministic init)
    w1 = jax.random.normal(k1, (span_embed_dim, hidden_dim), jnp.float32) / jnp.sqrt(span_embed_dim)
    b1 = jnp.zeros((hidden_dim,), jnp.float32)
    w2 = jax.random.normal(k2, (hidden_dim, hidden_dim), jnp.float32) / jnp.sqrt(hidden_dim)
    b2 = jnp.zeros((hidden_dim,), jnp.float32)
    # classifier: xavier_normal_
    std = jnp.sqrt(2.0 / (hidden_dim + n_labels))
    wc = std * jax.random.normal(k3, (hidden_dim, n_labels), jnp.float32)
    bc = jnp.zeros((n_labels,), jnp.float32)
    return (w1, b1, w2, b2, wc, bc)


if __name__ == "__main__":
    key = jax.random.PRNGKey(0)
    kx, km, kl, kp = jax.random.split(key, 4)

    batch, num_spans, span_embed_dim, hidden_dim, n_labels = 2, 8, 32, 32, 3

    span_embeddings = jax.random.normal(kx, (batch, num_spans, span_embed_dim), jnp.float32)
    span_mask = (jax.random.uniform(km, (batch, num_spans)) > 0.3).astype(jnp.int32)
    span_labels = jax.random.randint(kl, (batch, num_spans), 0, n_labels, jnp.int32)

    params = init_params(kp, span_embed_dim, hidden_dim, n_labels)
    prepared = prepare_params(params)   # one-time pad/cast, hoisted out of forward

    out = ner_forward(span_embeddings, span_mask, span_labels, prepared,
                      n_labels=n_labels)
    jax.block_until_ready(out)
    print("KERNEL_OK")
</pallas_src>

<mosaic_0001>
module attributes {stable_mosaic.version = 11 : i64} {
  func.func @ner_kernel(%arg0: i32, %arg1: memref<16x32xf32, #tpu.memory_space<vmem>>, %arg2: memref<16x1xi32, #tpu.memory_space<vmem>>, %arg3: memref<32x128xbf16, #tpu.memory_space<vmem>>, %arg4: memref<1x128xf32, #tpu.memory_space<vmem>>, %arg5: memref<128x128xbf16, #tpu.memory_space<vmem>>, %arg6: memref<1x128xf32, #tpu.memory_space<vmem>>, %arg7: memref<128x128xbf16, #tpu.memory_space<vmem>>, %arg8: memref<1x128xf32, #tpu.memory_space<vmem>>, %arg9: memref<16x128xbf16, #tpu.memory_space<vmem>>, %arg10: memref<1x1x128xf32, #tpu.memory_space<vmem>>) attributes {dimension_semantics = [#tpu.dimension_semantics<parallel>], iteration_bounds = array<i64: 1>, scalar_prefetch = 0 : i64, scratch_operands = 0 : i64, tpu.core_type = #tpu.core_type<tc>, window_params = [{transform_indices = @transform_0, window_bounds = array<i64: 16, 32>}, {transform_indices = @transform_1, window_bounds = array<i64: 16, 1>}, {pipeline_mode = #tpu.pipeline_mode<synchronous>, transform_indices = @transform_2, window_bounds = array<i64: 32, 128>}, {pipeline_mode = #tpu.pipeline_mode<synchronous>, transform_indices = @transform_3, window_bounds = array<i64: 1, 128>}, {pipeline_mode = #tpu.pipeline_mode<synchronous>, transform_indices = @transform_4, window_bounds = array<i64: 128, 128>}, {pipeline_mode = #tpu.pipeline_mode<synchronous>, transform_indices = @transform_5, window_bounds = array<i64: 1, 128>}, {pipeline_mode = #tpu.pipeline_mode<synchronous>, transform_indices = @transform_6, window_bounds = array<i64: 128, 128>}, {pipeline_mode = #tpu.pipeline_mode<synchronous>, transform_indices = @transform_7, window_bounds = array<i64: 1, 128>}, {transform_indices = @transform_8, window_bounds = array<i64: 16, 128>}, {transform_indices = @transform_9, window_bounds = array<i64: 1, 1, 128>}]} {
    %c0 = arith.constant 0 : index
    %c0_0 = arith.constant 0 : index
    %0 = vector.load %arg1[%c0, %c0_0] : memref<16x32xf32, #tpu.memory_space<vmem>>, vector<16x32xf32>
    %1 = arith.truncf %0 : vector<16x32xf32> to vector<16x32xbf16>
    %c0_1 = arith.constant 0 : index
    %c0_2 = arith.constant 0 : index
    %2 = vector.load %arg3[%c0_1, %c0_2] : memref<32x128xbf16, #tpu.memory_space<vmem>>, vector<32x128xbf16>
    %cst = arith.constant dense<0.000000e+00> : vector<16x128xf32>
    %3 = tpu.matmul %1, %2, %cst {dimension_numbers = #tpu.dot_dimension_numbers<[1], [0], [0], [1], [0, 0, 1, 1], [], []>} : vector<16x32xbf16>, vector<32x128xbf16>, vector<16x128xf32> -> vector<16x128xf32>
    %c0_3 = arith.constant 0 : index
    %c0_4 = arith.constant 0 : index
    %4 = vector.load %arg4[%c0_3, %c0_4] : memref<1x128xf32, #tpu.memory_space<vmem>>, vector<1x128xf32>
    %5 = vector.broadcast %4 : vector<1x128xf32> to vector<16x128xf32>
    %6 = arith.addf %3, %5 : vector<16x128xf32>
    %cst_5 = arith.constant 0.000000e+00 : f32
    %7 = vector.broadcast %cst_5 : f32 to vector<16x128xf32>
    %8 = arith.maximumf %6, %7 : vector<16x128xf32>
    %9 = arith.truncf %8 : vector<16x128xf32> to vector<16x128xbf16>
    %c0_6 = arith.constant 0 : index
    %c0_7 = arith.constant 0 : index
    %10 = vector.load %arg5[%c0_6, %c0_7] : memref<128x128xbf16, #tpu.memory_space<vmem>>, vector<128x128xbf16>
    %cst_8 = arith.constant dense<0.000000e+00> : vector<16x128xf32>
    %11 = tpu.matmul %9, %10, %cst_8 {dimension_numbers = #tpu.dot_dimension_numbers<[1], [0], [0], [1], [0, 0, 1, 1], [], []>} : vector<16x128xbf16>, vector<128x128xbf16>, vector<16x128xf32> -> vector<16x128xf32>
    %c0_9 = arith.constant 0 : index
    %c0_10 = arith.constant 0 : index
    %12 = vector.load %arg6[%c0_9, %c0_10] : memref<1x128xf32, #tpu.memory_space<vmem>>, vector<1x128xf32>
    %13 = vector.broadcast %12 : vector<1x128xf32> to vector<16x128xf32>
    %14 = arith.addf %11, %13 : vector<16x128xf32>
    %cst_11 = arith.constant 0.000000e+00 : f32
    %15 = vector.broadcast %cst_11 : f32 to vector<16x128xf32>
    %16 = arith.maximumf %14, %15 : vector<16x128xf32>
    %17 = arith.truncf %16 : vector<16x128xf32> to vector<16x128xbf16>
    %c0_12 = arith.constant 0 : index
    %c0_13 = arith.constant 0 : index
    %18 = vector.load %arg7[%c0_12, %c0_13] : memref<128x128xbf16, #tpu.memory_space<vmem>>, vector<128x128xbf16>
    %cst_14 = arith.constant dense<0.000000e+00> : vector<16x128xf32>
    %19 = tpu.matmul %17, %18, %cst_14 {dimension_numbers = #tpu.dot_dimension_numbers<[1], [0], [0], [1], [0, 0, 1, 1], [], []>} : vector<16x128xbf16>, vector<128x128xbf16>, vector<16x128xf32> -> vector<16x128xf32>
    %c0_15 = arith.constant 0 : index
    %c0_16 = arith.constant 0 : index
    %20 = vector.load %arg8[%c0_15, %c0_16] : memref<1x128xf32, #tpu.memory_space<vmem>>, vector<1x128xf32>
    %21 = vector.broadcast %20 : vector<1x128xf32> to vector<16x128xf32>
    %22 = arith.addf %19, %21 : vector<16x128xf32>
    %c0_17 = arith.constant 0 : index
    %c0_18 = arith.constant 0 : index
    %23 = vector.load %arg2[%c0_17, %c0_18] : memref<16x1xi32, #tpu.memory_space<vmem>>, vector<16x1xi32>
    %c0_i32 = arith.constant 0 : i32
    %24 = vector.broadcast %c0_i32 : i32 to vector<16x1xi32>
    %25 = arith.cmpi sge, %23, %24 : vector<16x1xi32>
    %26 = tpu.iota {dimensions = array<i32: 1>} : vector<16x128xi32>
    %c0_i32_19 = arith.constant 0 : i32
    %27 = vector.broadcast %c0_i32_19 : i32 to vector<16x128xi32>
    %28 = arith.cmpi eq, %26, %27 : vector<16x128xi32>
    %cst_20 = arith.constant dense<true> : vector<16x1xi1>
    %29 = arith.xori %25, %cst_20 : vector<16x1xi1>
    %30 = vector.broadcast %29 : vector<16x1xi1> to vector<16x128xi1>
    %31 = arith.andi %28, %30 : vector<16x128xi1>
    %cst_21 = arith.constant 1.000000e+20 : f32
    %32 = vector.broadcast %cst_21 : f32 to vector<16x128xf32>
    %33 = arith.select %31, %32, %22 : vector<16x128xi1>, vector<16x128xf32>
    %cst_22 = arith.constant dense<0xFF800000> : vector<16xf32>
    %34 = vector.multi_reduction <maximumf>, %33, %cst_22 [1] : vector<16x128xf32> to vector<16xf32>
    %35 = vector.shape_cast %34 : vector<16xf32> to vector<16x1xf32>
    %36 = vector.broadcast %35 : vector<16x1xf32> to vector<16x128xf32>
    %37 = arith.subf %33, %36 : vector<16x128xf32>
    %38 = math.exp %37 : vector<16x128xf32>
    %cst_23 = arith.constant dense<0.000000e+00> : vector<16xf32>
    %39 = vector.multi_reduction <add>, %38, %cst_23 [1] : vector<16x128xf32> to vector<16xf32>
    %40 = vector.shape_cast %39 : vector<16xf32> to vector<16x1xf32>
    %41 = vector.broadcast %40 : vector<16x1xf32> to vector<16x128xf32>
    %42 = arith.divf %38, %41 : vector<16x128xf32>
    %43 = arith.truncf %42 : vector<16x128xf32> to vector<16x128xbf16>
    %c0_24 = arith.constant 0 : index
    %c0_25 = arith.constant 0 : index
    %44 = vector.load %arg9[%c0_24, %c0_25] : memref<16x128xbf16, #tpu.memory_space<vmem>>, vector<16x128xbf16>
    tpu.vector_store %arg9[%c0_24, %c0_25], %43 {strides = array<i32>} : memref<16x128xbf16, #tpu.memory_space<vmem>>, vector<16x128xbf16>,
    %45 = math.log %40 : vector<16x1xf32>
    %46 = arith.addf %35, %45 : vector<16x1xf32>
    %47 = vector.broadcast %23 : vector<16x1xi32> to vector<16x128xi32>
    %48 = arith.cmpi eq, %26, %47 : vector<16x128xi32>
    %49 = vector.broadcast %25 : vector<16x1xi1> to vector<16x128xi1>
    %50 = arith.andi %49, %48 : vector<16x128xi1>
    %51 = vector.broadcast %46 : vector<16x1xf32> to vector<16x128xf32>
    %52 = arith.subf %51, %33 : vector<16x128xf32>
    %cst_26 = arith.constant 0.000000e+00 : f32
    %53 = vector.broadcast %cst_26 : f32 to vector<16x128xf32>
    %54 = arith.select %50, %52, %53 : vector<16x128xi1>, vector<16x128xf32>
    %cst_27 = arith.constant dense<0.000000e+00> : vector<128xf32>
    %55 = vector.multi_reduction <add>, %54, %cst_27 [0] : vector<16x128xf32> to vector<128xf32>
    %56 = vector.shape_cast %55 : vector<128xf32> to vector<1x128xf32>
    %57 = vector.shape_cast %56 : vector<1x128xf32> to vector<1x1x128xf32>
    %c0_28 = arith.constant 0 : index
    %c0_29 = arith.constant 0 : index
    %c0_30 = arith.constant 0 : index
    %58 = vector.load %arg10[%c0_28, %c0_29, %c0_30] : memref<1x1x128xf32, #tpu.memory_space<vmem>>, vector<1x1x128xf32>
    tpu.vector_store %arg10[%c0_28, %c0_29, %c0_30], %57 {strides = array<i32>} : memref<1x1x128xf32, #tpu.memory_space<vmem>>, vector<1x1x128xf32>,
    return
  }
  func.func @transform_0(%arg0: i32) -> (i32, i32) {
    %c0_i32 = arith.constant 0 : i32
    %c0_i32_0 = arith.constant 0 : i32
    return %arg0, %c0_i32 : i32, i32
  }
  func.func @transform_1(%arg0: i32) -> (i32, i32) {
    %c0_i32 = arith.constant 0 : i32
    %c0_i32_0 = arith.constant 0 : i32
    return %arg0, %c0_i32 : i32, i32
  }
  func.func @transform_2(%arg0: i32) -> (i32, i32) {
    %c0_i32 = arith.constant 0 : i32
    %c0_i32_0 = arith.constant 0 : i32
    %c0_i32_1 = arith.constant 0 : i32
    return %c0_i32, %c0_i32_0 : i32, i32
  }
  func.func @transform_3(%arg0: i32) -> (i32, i32) {
    %c0_i32 = arith.constant 0 : i32
    %c0_i32_0 = arith.constant 0 : i32
    %c0_i32_1 = arith.constant 0 : i32
    return %c0_i32, %c0_i32_0 : i32, i32
  }
  func.func @transform_4(%arg0: i32) -> (i32, i32) {
    %c0_i32 = arith.constant 0 : i32
    %c0_i32_0 = arith.constant 0 : i32
    %c0_i32_1 = arith.constant 0 : i32
    return %c0_i32, %c0_i32_0 : i32, i32
  }
  func.func @transform_5(%arg0: i32) -> (i32, i32) {
    %c0_i32 = arith.constant 0 : i32
    %c0_i32_0 = arith.constant 0 : i32
    %c0_i32_1 = arith.constant 0 : i32
    return %c0_i32, %c0_i32_0 : i32, i32
  }
  func.func @transform_6(%arg0: i32) -> (i32, i32) {
    %c0_i32 = arith.constant 0 : i32
    %c0_i32_0 = arith.constant 0 : i32
    %c0_i32_1 = arith.constant 0 : i32
    return %c0_i32, %c0_i32_0 : i32, i32
  }
  func.func @transform_7(%arg0: i32) -> (i32, i32) {
    %c0_i32 = arith.constant 0 : i32
    %c0_i32_0 = arith.constant 0 : i32
    %c0_i32_1 = arith.constant 0 : i32
    return %c0_i32, %c0_i32_0 : i32, i32
  }
  func.func @transform_8(%arg0: i32) -> (i32, i32) {
    %c0_i32 = arith.constant 0 : i32
    %c0_i32_0 = arith.constant 0 : i32
    return %arg0, %c0_i32 : i32, i32
  }
  func.func @transform_9(%arg0: i32) -> (i32, i32, i32) {
    %c0_i32 = arith.constant 0 : i32
    %c0_i32_0 = arith.constant 0 : i32
    %c0_i32_1 = arith.constant 0 : i32
    return %arg0, %c0_i32, %c0_i32_0 : i32, i32, i32
  }
}

</mosaic_0001>

<bundles_post_ra>
// kernel: ner_forward.1
= control target key start
LH: loop header
LB: loop body
LE: loop exit
PB: predicated region body
PF: predicated region fallthrough
CT: control target
= control target key end

     0   :  { %15 = vsyncpa [#allocation3], 0  ;;  %s796_s0 = inlined_call_operand.vmem [shape: f32[16,32], index: 0, kind: input, shape index: {}]   ;;  %s797_s1 = inlined_call_operand.vmem [shape: s32[16,1], index: 1, kind: input, shape index: {}]   ;;  %s798_s2 = inlined_call_operand.vmem [shape: bf16[32,128], index: 2, kind: input, shape index: {}]   ;;  %s799_s3 = inlined_call_operand.vmem [shape: f32[1,128], index: 3, kind: input, shape index: {}]   ;;  %s800_s4 = inlined_call_operand.hbm [shape: bf16[128,128], index: 4, kind: input, shape index: {}]   ;;  %s801_s5 = inlined_call_operand.vmem [shape: f32[1,128], index: 5, kind: input, shape index: {}]   ;;  %s802_s6 = inlined_call_operand.hbm [shape: bf16[128,128], index: 6, kind: input, shape index: {}]   ;;  %s803_s7 = inlined_call_operand.vmem [shape: f32[1,128], index: 7, kind: input, shape index: {}]   ;;  %s804_s8 = inlined_call_operand.vmem [shape: bf16[16,128], index: 8, kind: output, shape index: {0}]   ;;  %s805_s9 = inlined_call_operand.vmem [shape: f32[1,1,128], index: 9, kind: output, shape index: {1}]  }
   0x1   :  { %16 = vsyncpa [#allocation5], 0  ;;  %s648_s30 = smov [#allocation2]   ;;  %s600_s13 = scalar_lea.hbm %s800_s4, 1024 }
   0x2   :  { %s30_s10 = sshll.u32 %s648_s30, 4  ;;  %p601_p0 = scmp.ne.s32.totalorder %s800_s4, %s600_s13  ;;  %s31_s10 = int_to_ptr.vmem [resolvable:$true] %s30_s10 }
   0x3   :  { %p604_p1 = scmp.lt.u32.totalorder %s600_s13, %s800_s4 }
   0x5   :  { %p606_p2 = pnand %p604_p1, %p601_p0 }
   0x7   :  { %609 = shalt.err (!%p606_p2)
}
   0x8   :  { %s610_s18 = scalar_lea.vmem %s31_s10, 1024  ;;  %p615_p4 = scmp.lt.s32.totalorder %s31_s10, %s31_s10 }
   0x9   :  { %p611_p3 = scmp.ne.s32.totalorder %s31_s10, %s610_s18  ;;  %p616_p5 = scmp.lt.s32.totalorder %s610_s18, %s610_s18 }
   0xb   :  { %p617_p6 = por %p616_p5, %p615_p4 }
   0xd   :  { %p618_p7 = pnand %p617_p6, %p611_p3 }
   0xf   :  { %621 = shalt.err (!%p618_p7)
}
  0x10   :  { %s649_s19 = smov 64   ;;  %s650_s20 = smov 4  }
  0x11   :  { %36 = dma.hbm_to_vmem [thread:$0]  %s800_s4, 1024, %s31_s10, [#allocation3], %s649_s19, %s649_s19, %s650_s20  }
  0x12   :  { %s651_s23 = smov [#allocation4]   ;;  %s622_s27 = scalar_lea.hbm %s802_s6, 1024 }
  0x13   :  { %s44_s24 = sshll.u32 %s651_s23, 4  ;;  %p623_p8 = scmp.ne.s32.totalorder %s802_s6, %s622_s27  ;;  %s45_s24 = int_to_ptr.vmem [resolvable:$true] %s44_s24 }
  0x14   :  { %p626_p9 = scmp.lt.u32.totalorder %s622_s27, %s802_s6 }
  0x16   :  { %p628_p10 = pnand %p626_p9, %p623_p8 }
  0x18   :  { %631 = shalt.err (!%p628_p10)
}
  0x19   :  { %s632_s12 = scalar_lea.vmem %s45_s24, 1024  ;;  %p637_p12 = scmp.lt.s32.totalorder %s45_s24, %s45_s24 }
  0x1a   :  { %p633_p11 = scmp.ne.s32.totalorder %s45_s24, %s632_s12  ;;  %p638_p13 = scmp.lt.s32.totalorder %s632_s12, %s632_s12 }
  0x1c   :  { %p639_p0 = por %p638_p13, %p637_p12 }
  0x1e   :  { %p640_p1 = pnand %p639_p0, %p633_p11 }
  0x20   :  { %643 = shalt.err (!%p640_p1)
}
  0x21   :  { %50 = dma.hbm_to_vmem [thread:$0]  %s802_s6, 1024, %s45_s24, [#allocation5], %s649_s19, %s649_s19, %s650_s20  }
  0x22   :  { %644 = dma.done.wait [#allocation3], 1024  }
  0x23   :  { %645 = vsyncadd [#allocation3], 4294966272 }
  0x24   :  { %646 = dma.done.wait [#allocation5], 1024  }
  0x25   :  { %647 = vsyncadd [#allocation5], 4294966272  ;;  %v652_v0 = vmov 0.0   ;;  %vm653_vm0 = vmmov 0   ;;  %v570_v1 = vld [vmem:[%s798_s2] sm:$0xff]   ;;  %v571_v2 = vld [vmem:[%s798_s2 + $0x8] sm:$0xff]   ;;  %v365_v47 = vlaneseq }
  0x26   :  { %512 = vmatprep.subr.bf16.mxu0 %v652_v0  ;;  %516 = vmatprep.mubr.msk.bf16.mxu0 %vm653_vm0, %v652_v0  ;;  %v60_v3 = vld [vmem:[%s796_s0] sm:$0xff]  ;;  %v61_v4 = vld [vmem:[%s796_s0 + $0x8] sm:$0xff]  ;;  %vm86_vm1 = vcmask 261120   ;;  %v574_v8 = vld [vmem:[#allocation2 + $0x10] sm:$0xff]   ;;  %v654_v34 = vmov 0   ;;  %vm655_vm4 = vmmov 1  }
  0x27   :  { %520 = vmatprep.subr.bf16.mxu1 %v652_v0  ;;  %536 = vmatprep.mubr.msk.bf16.mxu1 %vm653_vm0, %v652_v0  ;;  %v572_v5 = vld [vmem:[#allocation2] sm:$0xff]   ;;  %v62_v6 = vpack.c.bf16 %v61_v4, %v60_v3  ;;  %v573_v7 = vld [vmem:[#allocation2 + $0x8] sm:$0xff]   ;;  %v575_v9 = vld [vmem:[#allocation2 + $0x18] sm:$0xff]   ;;  %v780_v48 = vand.u32 127, %v365_v47 }
  0x28   :  { %513 = vmatpush3.bf16.msra.mxu0 %v570_v1  ;;  %521 = vmatpush3.bf16.msra.mxu1 %v572_v5  ;;  %v576_v10 = vld [vmem:[#allocation2 + $0x20] sm:$0xff]   ;;  %v577_v11 = vld [vmem:[#allocation2 + $0x28] sm:$0xff]   ;;  %v578_v12 = vld [vmem:[#allocation2 + $0x30] sm:$0xff]  }
  0x29   :  { %514 = vmatprep.subr.bf16.mxu0 %v652_v0  ;;  %522 = vmatprep.subr.bf16.mxu1 %v652_v0  ;;  %v579_v13 = vld [vmem:[#allocation2 + $0x38] sm:$0xff]   ;;  %v580_v14 = vld [vmem:[#allocation4] sm:$0xff]   ;;  %v581_v15 = vld [vmem:[#allocation4 + $0x8] sm:$0xff]   ;;  %vm367_vm7 = vcmp.eq.s32.totalorder %v780_v48, 0 }
  0x2a   :  { %v582_v16 = vld [vmem:[#allocation4 + $0x10] sm:$0xff]   ;;  %v583_v17 = vld [vmem:[#allocation4 + $0x18] sm:$0xff]   ;;  %v584_v18 = vld [vmem:[#allocation4 + $0x20] sm:$0xff]   ;;  %568 = vset.pattern.permute.xlu0 %v654_v34  ;;  %569 = vset.pattern.permute.xlu1 %v654_v34 }
  0x2b   :  { %v585_v19 = vld [vmem:[#allocation4 + $0x28] sm:$0xff]   ;;  %v460_v20 = vld [vmem:[%s799_s3] ss:$0 sm:$0xff]  ;;  %v586_v30 = vld [vmem:[#allocation4 + $0x30] sm:$0xff]  }
  0x2c   :  { %515 = vmatpush3.bf16.msra.mxu0 %v571_v2  ;;  %523 = vmatpush3.bf16.msra.mxu1 %v573_v7  ;;  %v587_v31 = vld [vmem:[#allocation4 + $0x38] sm:$0xff]   ;;  %v361_v32 = vld [vmem:[%s797_s1] sm:$0xff]  ;;  %v362_v33 = vld [vmem:[%s797_s1 + $0x8] sm:$0xff] }
  0x2d   :  { %540 = vmatprep.subr.bf16.mxu0 %v652_v0  ;;  %524 = vmatprep.subr.bf16.mxu1 %v652_v0  ;;  %vm363_vm2 = vcmp.ge.s32.totalorder %v361_v32, 0  ;;  %vm364_vm3 = vcmp.ge.s32.totalorder %v362_v33, 0  ;;  %v464_v37 = vld [vmem:[%s801_s5] ss:$0 sm:$0xff] }
  0x2e   :  { %vm368_vm5 = vmxor %vm363_vm2, %vm655_vm4  ;;  %v473_v50 = vld [vmem:[%s803_s7] ss:$0 sm:$0xff]  ;;  %v426_v60 = vsel %vm363_vm2, 1, %v654_v34  ;;  %v427_v5 = vsel %vm364_vm3, 1, %v654_v34 }
  0x2f   :  { %517 = vmatmul.mubr.msk.bf16.vlgmr.msra.gmra.mrb[0].mxu0 %vm86_vm1, %v62_v6  ;;  %v370_v35 = vsel %vm368_vm5, 1, %v654_v34  ;;  %vm369_vm6 = vmxor %vm364_vm3, %vm655_vm4 }
  0x30   :  { %556 = vmatprep.mubr.msk.bf16.mxu0 %vm653_vm0, %v652_v0  ;;  %525 = vmatpush3.bf16.msra.mxu1 %v574_v8  ;;  %v371_v36 = vsel %vm369_vm6, 1, %v654_v34 }
  0x31   :  { %526 = vmatprep.subr.bf16.mxu1 %v652_v0  ;;  %541 = vmatpush3.bf16.msra.mxu0 %v580_v14 }
  0x32   :  { %542 = vmatprep.subr.bf16.mxu0 %v652_v0  ;;  %373 = vperm.xlu0 %568, %v370_v35  }
  0x34   :  { %527 = vmatpush3.bf16.msra.mxu1 %v575_v9 }
  0x35   :  { %528 = vmatprep.subr.bf16.mxu1 %v652_v0  ;;  %543 = vmatpush3.bf16.msra.mxu0 %v581_v15 }
  0x36   :  { %544 = vmatprep.subr.bf16.mxu0 %v652_v0  ;;  %376 = vperm.xlu0 %568, %v371_v36  }
  0x38   :  { %529 = vmatpush3.bf16.msra.mxu1 %v576_v10 }
  0x39   :  { %530 = vmatprep.subr.bf16.mxu1 %v652_v0  ;;  %545 = vmatpush3.bf16.msra.mxu0 %v582_v16 }
  0x3a   :  { %546 = vmatprep.subr.bf16.mxu0 %v652_v0 }
  0x3c   :  { %531 = vmatpush3.bf16.msra.mxu1 %v577_v11 }
  0x3d   :  { %532 = vmatprep.subr.bf16.mxu1 %v652_v0  ;;  %547 = vmatpush3.bf16.msra.mxu0 %v583_v17 }
  0x3e   :  { %548 = vmatprep.subr.bf16.mxu0 %v652_v0 }
  0x40   :  { %533 = vmatpush3.bf16.msra.mxu1 %v578_v12 }
  0x41   :  { %534 = vmatprep.subr.bf16.mxu1 %v652_v0  ;;  %549 = vmatpush3.bf16.msra.mxu0 %v584_v18 }
  0x42   :  { %550 = vmatprep.subr.bf16.mxu0 %v652_v0 }
  0x44   :  { %535 = vmatpush3.bf16.msra.mxu1 %v579_v13 }
  0x45   :  { %551 = vmatpush3.bf16.msra.mxu0 %v585_v19 }
  0x46   :  { %552 = vmatprep.subr.bf16.mxu0 %v652_v0 }
  0x49   :  { %553 = vmatpush3.bf16.msra.mxu0 %v586_v30 }
  0x4a   :  { %554 = vmatprep.subr.bf16.mxu0 %v652_v0 }
  0x4d   :  { %555 = vmatpush3.bf16.msra.mxu0 %v587_v31 }
  0xb1   :  { %v374_v49 = vpop.permute.xlu0 %373 }
  0xb2   :  { %vm378_vm8 = vcmp.eq.s32.totalorder %v374_v49, 1 }
  0xb3   :  { %vm380_vm9 = vmand %vm367_vm7, %vm378_vm8 }
  0xb5   :  { %v377_v51 = vpop.permute.xlu0 %376 }
  0xb6   :  { %vm379_vm10 = vcmp.eq.s32.totalorder %v377_v51, 1 }
  0xb7   :  { %vm381_vm11 = vmand %vm367_vm7, %vm379_vm10 }
 0x102   :  { %v124_v21 = vpop.f32.mrb[0].mxu0 }
 0x103   :  { %v125_v22 = vadd.f32 %v460_v20, %v124_v21  ;;  %v518_v23 = vpop.f32.mrb[1].mxu0 }
 0x104   :  { %v127_v24 = vpop.f32.mrb[2].mxu0 }
 0x105   :  { %v128_v25 = vadd.f32 %v460_v20, %v127_v24  ;;  %v519_v26 = vpop.f32.mrb[3].mxu0  ;;  %v131_v27 = vmax.f32 %v125_v22, 0.0 }
 0x107   :  { %v132_v28 = vmax.f32 %v128_v25, 0.0 }
 0x109   :  { %v133_v29 = vpack.c.bf16 %v132_v28, %v131_v27 }
 0x10b   :  { %537 = vmatmul.mubr.bf16.vlgmr.msra.gmra.mrb[0].mxu1 %v133_v29 }
 0x1de   :  { %v239_v38 = vpop.f32.mrb[0].mxu1 }
 0x1df   :  { %v240_v39 = vadd.f32 %v464_v37, %v239_v38  ;;  %v538_v40 = vpop.f32.mrb[1].mxu1 }
 0x1e0   :  { %v242_v41 = vpop.f32.mrb[2].mxu1 }
 0x1e1   :  { %v243_v42 = vadd.f32 %v464_v37, %v242_v41  ;;  %v539_v43 = vpop.f32.mrb[3].mxu1  ;;  %v246_v44 = vmax.f32 %v240_v39, 0.0 }
 0x1e3   :  { %v247_v45 = vmax.f32 %v243_v42, 0.0 }
 0x1e5   :  { %v248_v46 = vpack.c.bf16 %v247_v45, %v246_v44 }
 0x1e7   :  { %557 = vmatmul.mubr.bf16.vlgmr.msra.gmra.mrb[4].mxu0 %v248_v46 }
 0x2ba   :  { %v354_v52 = vpop.f32.mrb[4].mxu0 }
 0x2bb   :  { %v355_v53 = vadd.f32 %v473_v50, %v354_v52  ;;  %v558_v54 = vpop.f32.mrb[5].mxu0 }
 0x2bc   :  { %v357_v55 = vpop.f32.mrb[6].mxu0 }
 0x2bd   :  { %v358_v56 = vadd.f32 %v473_v50, %v357_v55  ;;  %v559_v57 = vpop.f32.mrb[7].mxu0  ;;  %v382_v58 = vsel %vm380_vm9, 1e+20, %v355_v53 }
 0x2be   :  { %384 = vmax.xlane.f32.xlu1 %v382_v58 }
 0x2bf   :  { %v383_v59 = vsel %vm381_vm11, 1e+20, %v358_v56 }
 0x2c2   :  { %386 = vmax.xlane.f32.xlu1 %v383_v59 }
 0x2d3   :  { %419 = vperm.xlu1 %569, %v361_v32  }
 0x2d7   :  { %422 = vperm.xlu1 %569, %v362_v33  }
 0x2db   :  { %429 = vperm.xlu1 %569, %v426_v60  }
 0x34b   :  { %v385_v61 = vpop.xlane.xlu1 %384 }
 0x34c   :  { %v388_v62 = vsub.f32 %v382_v58, %v385_v61 }
 0x34e   :  { %v390_v63 = vmul.f32 1.442695, %v388_v62 }
 0x34f   :  { %v387_v0 = vpop.xlane.xlu1 %386 }
 0x350   :  { %588 = vpow2.f32 %v390_v63  ;;  %v389_v1 = vsub.f32 %v383_v59, %v387_v0 }
 0x352   :  { %v392_v2 = vmul.f32 1.442695, %v389_v1 }
 0x353   :  { %v420_v6 = vpop.permute.xlu1 %419 }
 0x354   :  { %590 = vpow2.f32 %v392_v2  ;;  %vm424_vm12 = vcmp.eq.s32.totalorder %v780_v48, %v420_v6 }
 0x357   :  { %v423_v7 = vpop.permute.xlu1 %422 }
 0x358   :  { %vm425_vm15 = vcmp.eq.s32.totalorder %v780_v48, %v423_v7 }
 0x35a   :  { %v589_v3 = vpop.eup %588 }
 0x35b   :  { %394 = vadd.xlane.f32.xlu0 %v589_v3  ;;  %v430_v8 = vpop.permute.xlu1 %429 }
 0x35c   :  { %vm434_vm13 = vcmp.eq.s32.totalorder %v430_v8, 1 }
 0x35d   :  { %vm436_vm0 = vmand %vm434_vm13, %vm424_vm12 }
 0x35e   :  { %v591_v4 = vpop.eup %590 }
 0x35f   :  { %396 = vadd.xlane.f32.xlu1 %v591_v4 }
 0x370   :  { %432 = vperm.xlu1 %569, %v427_v5  }
 0x3e8   :  { %v395_v9 = vpop.xlane.xlu0 %394 }
 0x3e9   :  { %592 = vlog2.f32 %v395_v9 }
 0x3ea   :  { %594 = vrcp.f32 %v395_v9 }
 0x3ec   :  { %v397_v10 = vpop.xlane.xlu1 %396 }
 0x3ed   :  { %596 = vrcp.f32 %v397_v10 }
 0x3ee   :  { %598 = vlog2.f32 %v397_v10 }
 0x3f0   :  { %v433_v19 = vpop.permute.xlu1 %432 }
 0x3f1   :  { %vm435_vm14 = vcmp.eq.s32.totalorder %v433_v19, 1 }
 0x3f2   :  { %vm437_vm1 = vmand %vm435_vm14, %vm425_vm15 }
 0x3f3   :  { %v593_v11 = vpop.eup %592 }
 0x3f4   :  { %v595_v12 = vpop.eup %594  ;;  %v413_v13 = vmul.f32 0.6931472, %v593_v11 }
 0x3f5   :  { %v399_v17 = vmul.f32 %v595_v12, %v589_v3 }
 0x3f6   :  { %v416_v15 = vadd.f32 %v413_v13, %v385_v61 }
 0x3f7   :  { %v597_v14 = vpop.eup %596 }
 0x3f8   :  { %v599_v16 = vpop.eup %598  ;;  %v401_v18 = vmul.f32 %v597_v14, %v591_v4  ;;  %v438_v23 = vsub.f32 %v416_v15, %v382_v58 }
 0x3f9   :  { %v415_v20 = vmul.f32 0.6931472, %v599_v16 }
 0x3fa   :  { %v489_v21 = vpack.c.bf16 %v401_v18, %v399_v17  ;;  %v440_v25 = vsel %vm436_vm0, %v438_v23, 0.0 }
 0x3fb   :  { %v417_v22 = vadd.f32 %v415_v20, %v387_v0 }
 0x3fc   :  { %490 = vst [vmem:[%s804_s8] sm:$0xff] %v489_v21  }
 0x3fd   :  { %v439_v24 = vsub.f32 %v417_v22, %v383_v59 }
 0x3ff   :  { %v441_v26 = vsel %vm437_vm1, %v439_v24, 0.0 }
 0x400   :  { %v442_v27 = vadd.f32 %v441_v26, %v440_v25 }
 0x402   :  { %v443_v28 = vrot.slane %v442_v27, 4 }
 0x404   :  { %v444_v29 = vadd.f32 %v443_v28, %v442_v27 }
 0x406   :  { %v445_v30 = vrot.slane %v444_v29, 2 }
 0x408   :  { %v446_v31 = vadd.f32 %v445_v30, %v444_v29 }
 0x40a   :  { %v447_v32 = vrot.slane %v446_v31, 1 }
 0x40c   :  { %v448_v33 = vadd.f32 %v447_v32, %v446_v31 }
 0x40e   :  { %449 = vst [vmem:[%s805_s9] sm:$0x1] %v448_v33 }
 0x40f   :  { %458 = vsyncpa [#allocation3], 1 }
 0x410   :  { %459 = vsyncpa [#allocation5], 1 }

</bundles_post_ra>
